<compile_context>
chip_gen: v7x
topology: tpu7x:2x2x1
jax: 0.10.0
libtpu: 0.0.40
codegen_flags: <defaults>
</compile_context>

<pallas_src>
import functools

import numpy as np
import jax
import jax.numpy as jnp
from jax.experimental import pallas as pl
from jax.experimental.pallas import tpu as pltpu


def _linear_interp_matrix(out_size: int, in_size: int) -> np.ndarray:
    """1-D linear interpolation matrix with PyTorch align_corners=True semantics."""
    A = np.zeros((out_size, in_size), dtype=np.float32)
    for o in range(out_size):
        src = 0.0 if out_size == 1 else o * (in_size - 1) / (out_size - 1)
        lo = min(int(np.floor(src)), in_size - 1)
        hi = min(lo + 1, in_size - 1)
        frac = src - lo
        A[o, lo] += 1.0 - frac
        A[o, hi] += frac
    return A


def _pick_batch(nc, din, dout, hwin, hwout, budget_bytes):
    """Largest #slabs per grid step whose VMEM blocks fit a budget.

    Validity: either B == NC (block equals full array) or both B*Din and B*Dout are
    multiples of 8 (sublane constraint on the second-to-last block dim).
    """
    cands = []
    for d in range(1, nc + 1):
        if nc % d:
            continue
        if d != nc and ((d * din) % 8 or (d * dout) % 8):
            continue
        cands.append(d)
    best = cands[0]
    for d in cands:  # ascending; keep the largest that fits the budget
        est = 8 * (d * din * hwin + d * dout * hwout
                   + (d * dout) * (d * din) + hwin * hwout)  # f32, double-buffered
        if est <= budget_bytes:
            best = d
    return best


def _resample_clip(x_ref, adb_ref, ahw_ref, clip_lo, clip_hi):
    """Trilinear (align_corners=True) resample of B stacked (n,c) slabs + clamp.

    x_ref   : (B*Din, Hin*Win)      B slabs stacked along rows (original dtype)
    adb_ref : (B*Dout, B*Din)       block-diag depth operator kron(I_B, A_d)
    ahw_ref : (Hin*Win, Hout*Wout)  fused H/W operator kron(A_h, A_w)^T
    returns : (B*Dout, Hout*Wout) f32
    """
    x = x_ref[...].astype(jnp.float32)
    t = jnp.dot(x, ahw_ref[...], preferred_element_type=jnp.float32)
    y = jnp.dot(adb_ref[...], t, preferred_element_type=jnp.float32)
    return jnp.clip(y, clip_lo, clip_hi)


def _stats_kernel(x_ref, adb_ref, ahw_ref, psum_ref, pm2_ref, *, clip_lo, clip_hi):
    # Per-program partial statistics: sum and centered sum of squared deviations.
    y = _resample_clip(x_ref, adb_ref, ahw_ref, clip_lo, clip_hi)
    s = jnp.sum(y)
    m = s / y.size
    d = y - m
    m2 = jnp.sum(d * d)
    psum_ref[...] = jnp.zeros_like(psum_ref) + s
    pm2_ref[...] = jnp.zeros_like(pm2_ref) + m2


def _resample_norm_kernel(x_ref, adb_ref, ahw_ref, mean_ref, inv_ref, o_ref,
                          *, clip_lo, clip_hi):
    # Recompute the (cheap) resample + clamp instead of round-tripping y via HBM.
    y = _resample_clip(x_ref, adb_ref, ahw_ref, clip_lo, clip_hi)
    o_ref[...] = ((y - mean_ref[0, 0]) * inv_ref[0, 0]).astype(o_ref.dtype)


def input_layer_forward(x, input_size, clip_window, *, vmem_block_budget=8 << 20):
    """Pallas implementation of InputLayer.forward (trilinear resample, clamp, normalize)."""
    N, C, Din, Hin, Win = x.shape
    Dout, Hout, Wout = input_size
    NC = N * C
    HWin = Hin * Win
    HWout = Hout * Wout
    clip_lo, clip_hi = float(clip_window[0]), float(clip_window[1])

    B = _pick_batch(NC, Din, Dout, HWin, HWout, vmem_block_budget)
    G = NC // B

    # Static interpolation operators (glue / parameter setup).
    ad = _linear_interp_matrix(Dout, Din)
    ah = _linear_interp_matrix(Hout, Hin)
    aw = _linear_interp_matrix(Wout, Win)
    ahw_t = jnp.asarray(np.kron(ah, aw).T.copy())                       # (HWin, HWout)
    adb = jnp.asarray(np.kron(np.eye(B, dtype=np.float32), ad))         # (B*Dout, B*Din)

    # Free metadata reshape; keep original dtype (cast happens inside the kernel).
    x2 = x.reshape(NC * Din, HWin)

    stats_kern = functools.partial(_stats_kernel, clip_lo=clip_lo, clip_hi=clip_hi)
    psum, pm2 = pl.pallas_call(
        stats_kern,
        out_shape=(
            jax.ShapeDtypeStruct((G, 1, 1), jnp.float32),
            jax.ShapeDtypeStruct((G, 1, 1), jnp.float32),
        ),
        grid=(G,),
        in_specs=[
            pl.BlockSpec((B * Din, HWin), lambda g: (g, 0)),
            pl.BlockSpec((B * Dout, B * Din), lambda g: (0, 0)),
            pl.BlockSpec((HWin, HWout), lambda g: (0, 0)),
        ],
        out_specs=(
            pl.BlockSpec((1, 1, 1), lambda g: (g, 0, 0)),
            pl.BlockSpec((1, 1, 1), lambda g: (g, 0, 0)),
        ),
        compiler_params=pltpu.CompilerParams(dimension_semantics=("parallel",)),
    )(x2, adb, ahw_t)

    # Tiny scalar glue: combine per-program partials (Chan's parallel variance).
    n_blk = B * Dout * HWout
    n_total = NC * Dout * HWout
    psum = psum.reshape(G)
    pm2 = pm2.reshape(G)
    total = jnp.sum(psum)
    mean = total / n_total
    bmean = psum / n_blk
    m2_total = jnp.sum(pm2) + n_blk * jnp.sum((bmean - mean) ** 2)
    var = m2_total / (n_total - 1)          # torch.std default: unbiased (ddof=1)
    std = jnp.sqrt(var)
    inv = 1.0 / (jnp.float32(1e-5) + std)
    mean_a = mean.reshape(1, 1).astype(jnp.float32)
    inv_a = inv.reshape(1, 1).astype(jnp.float32)

    norm_kern = functools.partial(_resample_norm_kernel, clip_lo=clip_lo, clip_hi=clip_hi)
    out2 = pl.pallas_call(
        norm_kern,
        out_shape=jax.ShapeDtypeStruct((NC * Dout, HWout), jnp.float32),
        grid=(G,),
        in_specs=[
            pl.BlockSpec((B * Din, HWin), lambda g: (g, 0)),
            pl.BlockSpec((B * Dout, B * Din), lambda g: (0, 0)),
            pl.BlockSpec((HWin, HWout), lambda g: (0, 0)),
            pl.BlockSpec((1, 1), lambda g: (0, 0)),
            pl.BlockSpec((1, 1), lambda g: (0, 0)),
        ],
        out_specs=pl.BlockSpec((B * Dout, HWout), lambda g: (g, 0)),
        compiler_params=pltpu.CompilerParams(dimension_semantics=("parallel",)),
    )(x2, adb, ahw_t, mean_a, inv_a)

    return out2.reshape(N, C, Dout, Hout, Wout)


def _reference(x, input_size, clip_window):
    """Pure-JAX reference with identical trilinear (align_corners=True) semantics."""
    ad = jnp.asarray(_linear_interp_matrix(input_size[0], x.shape[2]))
    ah = jnp.asarray(_linear_interp_matrix(input_size[1], x.shape[3]))
    aw = jnp.asarray(_linear_interp_matrix(input_size[2], x.shape[4]))
    y = jnp.einsum('Dd,ncdhw->ncDhw', ad, x.astype(jnp.float32))
    y = jnp.einsum('Hh,ncdhw->ncdHw', ah, y)
    y = jnp.einsum('Ww,ncdhw->ncdhW', aw, y)
    y = jnp.clip(y, clip_window[0], clip_window[1])
    mean = jnp.mean(y)
    std = jnp.std(y, ddof=1)  # torch.std default: unbiased
    return (y - mean) / (1e-5 + std)


if __name__ == "__main__":
    key = jax.random.PRNGKey(0)
    N, C, Din, Hin, Win = 2, 1, 6, 10, 12
    input_size = (8, 16, 16)        # (D_out, H_out, W_out)
    clip_window = (-1.0, 1.5)

    x = jax.random.normal(key, (N, C, Din, Hin, Win), dtype=jnp.float32)

    out = input_layer_forward(x, input_size, clip_window)
    out = jax.block_until_ready(out)

    ref = _reference(x, input_size, clip_window)
    assert out.shape == (N, C) + tuple(input_size)
    np.testing.assert_allclose(np.asarray(out), np.asarray(ref), rtol=2e-3, atol=2e-3)

    print("KERNEL_OK")
</pallas_src>

<mosaic_0001>
module attributes {stable_mosaic.version = 11 : i64} {
  func.func @_stats_kernel(%arg0: i32, %arg1: memref<12x120xf32, #tpu.memory_space<vmem>>, %arg2: memref<16x12xf32, #tpu.memory_space<vmem>>, %arg3: memref<120x256xf32, #tpu.memory_space<vmem>>, %arg4: memref<1x1x1xf32, #tpu.memory_space<vmem>>, %arg5: memref<1x1x1xf32, #tpu.memory_space<vmem>>) attributes {dimension_semantics = [#tpu.dimension_semantics<parallel>], iteration_bounds = array<i64: 1>, scalar_prefetch = 0 : i64, scratch_operands = 0 : i64, tpu.core_type = #tpu.core_type<tc>, window_params = [{transform_indices = @transform_0, window_bounds = array<i64: 12, 120>}, {pipeline_mode = #tpu.pipeline_mode<synchronous>, transform_indices = @transform_1, window_bounds = array<i64: 16, 12>}, {pipeline_mode = #tpu.pipeline_mode<synchronous>, transform_indices = @transform_2, window_bounds = array<i64: 120, 256>}, {transform_indices = @transform_3, window_bounds = array<i64: 1, 1, 1>}, {transform_indices = @transform_4, window_bounds = array<i64: 1, 1, 1>}]} {
    %c0 = arith.constant 0 : index
    %c0_0 = arith.constant 0 : index
    %0 = vector.load %arg1[%c0, %c0_0] : memref<12x120xf32, #tpu.memory_space<vmem>>, vector<12x120xf32>
    %c0_1 = arith.constant 0 : index
    %c0_2 = arith.constant 0 : index
    %1 = vector.load %arg3[%c0_1, %c0_2] : memref<120x256xf32, #tpu.memory_space<vmem>>, vector<120x256xf32>
    %cst = arith.constant dense<0.000000e+00> : vector<12x256xf32>
    %2 = tpu.matmul %0, %1, %cst {dimension_numbers = #tpu.dot_dimension_numbers<[1], [0], [0], [1], [0, 0, 1, 1], [], []>} : vector<12x120xf32>, vector<120x256xf32>, vector<12x256xf32> -> vector<12x256xf32>
    %c0_3 = arith.constant 0 : index
    %c0_4 = arith.constant 0 : index
    %3 = vector.load %arg2[%c0_3, %c0_4] : memref<16x12xf32, #tpu.memory_space<vmem>>, vector<16x12xf32>
    %cst_5 = arith.constant dense<0.000000e+00> : vector<16x256xf32>
    %4 = tpu.matmul %3, %2, %cst_5 {dimension_numbers = #tpu.dot_dimension_numbers<[1], [0], [0], [1], [0, 0, 1, 1], [], []>} : vector<16x12xf32>, vector<12x256xf32>, vector<16x256xf32> -> vector<16x256xf32>
    %cst_6 = arith.constant -1.000000e+00 : f32
    %cst_7 = arith.constant 1.500000e+00 : f32
    %5 = vector.broadcast %cst_6 : f32 to vector<16x256xf32>
    %6 = arith.maximumf %5, %4 : vector<16x256xf32>
    %7 = vector.broadcast %cst_7 : f32 to vector<16x256xf32>
    %8 = arith.minimumf %7, %6 : vector<16x256xf32>
    %9 = vector.shape_cast %8 : vector<16x256xf32> to vector<1x16x256xf32>
    %cst_8 = arith.constant dense<0.000000e+00> : vector<1xf32>
    %10 = vector.multi_reduction <add>, %9, %cst_8 [1, 2] : vector<1x16x256xf32> to vector<1xf32>
    %11 = vector.shape_cast %10 : vector<1xf32> to vector<1x1x1xf32>
    %12 = vector.extract %11[0, 0, 0] : f32 from vector<1x1x1xf32>
    %cst_9 = arith.constant 4.096000e+03 : f32
    %13 = arith.divf %12, %cst_9 : f32
    %14 = vector.broadcast %13 : f32 to vector<16x256xf32>
    %15 = arith.subf %8, %14 : vector<16x256xf32>
    %16 = arith.mulf %15, %15 : vector<16x256xf32>
    %17 = vector.shape_cast %16 : vector<16x256xf32> to vector<1x16x256xf32>
    %cst_10 = arith.constant dense<0.000000e+00> : vector<1xf32>
    %18 = vector.multi_reduction <add>, %17, %cst_10 [1, 2] : vector<1x16x256xf32> to vector<1xf32>
    %19 = vector.shape_cast %18 : vector<1xf32> to vector<1x1x1xf32>
    %20 = vector.extract %19[0, 0, 0] : f32 from vector<1x1x1xf32>
    %cst_11 = arith.constant 0.000000e+00 : f32
    %21 = vector.broadcast %cst_11 : f32 to vector<1x1x1xf32>
    %22 = vector.broadcast %12 : f32 to vector<1x1x1xf32>
    %23 = arith.addf %21, %22 : vector<1x1x1xf32>
    %c0_12 = arith.constant 0 : index
    %c0_13 = arith.constant 0 : index
    %c0_14 = arith.constant 0 : index
    %24 = vector.load %arg4[%c0_12, %c0_13, %c0_14] : memref<1x1x1xf32, #tpu.memory_space<vmem>>, vector<1x1x1xf32>
    tpu.vector_store %arg4[%c0_12, %c0_13, %c0_14], %23 {strides = array<i32>} : memref<1x1x1xf32, #tpu.memory_space<vmem>>, vector<1x1x1xf32>,
    %cst_15 = arith.constant 0.000000e+00 : f32
    %25 = vector.broadcast %cst_15 : f32 to vector<1x1x1xf32>
    %26 = vector.broadcast %20 : f32 to vector<1x1x1xf32>
    %27 = arith.addf %25, %26 : vector<1x1x1xf32>
    %c0_16 = arith.constant 0 : index
    %c0_17 = arith.constant 0 : index
    %c0_18 = arith.constant 0 : index
    %28 = vector.load %arg5[%c0_16, %c0_17, %c0_18] : memref<1x1x1xf32, #tpu.memory_space<vmem>>, vector<1x1x1xf32>
    tpu.vector_store %arg5[%c0_16, %c0_17, %c0_18], %27 {strides = array<i32>} : memref<1x1x1xf32, #tpu.memory_space<vmem>>, vector<1x1x1xf32>,
    return
  }
  func.func @transform_0(%arg0: i32) -> (i32, i32) {
    %c0_i32 = arith.constant 0 : i32
    %c0_i32_0 = arith.constant 0 : i32
    return %arg0, %c0_i32 : i32, i32
  }
  func.func @transform_1(%arg0: i32) -> (i32, i32) {
    %c0_i32 = arith.constant 0 : i32
    %c0_i32_0 = arith.constant 0 : i32
    %c0_i32_1 = arith.constant 0 : i32
    return %c0_i32, %c0_i32_0 : i32, i32
  }
  func.func @transform_2(%arg0: i32) -> (i32, i32) {
    %c0_i32 = arith.constant 0 : i32
    %c0_i32_0 = arith.constant 0 : i32
    %c0_i32_1 = arith.constant 0 : i32
    return %c0_i32, %c0_i32_0 : i32, i32
  }
  func.func @transform_3(%arg0: i32) -> (i32, i32, i32) {
    %c0_i32 = arith.constant 0 : i32
    %c0_i32_0 = arith.constant 0 : i32
    %c0_i32_1 = arith.constant 0 : i32
    return %arg0, %c0_i32, %c0_i32_0 : i32, i32, i32
  }
  func.func @transform_4(%arg0: i32) -> (i32, i32, i32) {
    %c0_i32 = arith.constant 0 : i32
    %c0_i32_0 = arith.constant 0 : i32
    %c0_i32_1 = arith.constant 0 : i32
    return %arg0, %c0_i32, %c0_i32_0 : i32, i32, i32
  }
}

</mosaic_0001>

<bundles_post_ra>
// kernel: tpu_custom_call.1
= control target key start
LH: loop header
LB: loop body
LE: loop exit
PB: predicated region body
PF: predicated region fallthrough
CT: control target
= control target key end

     0   :  { %10 = vsyncpa [#allocation3], 0  ;;  %s631_s0 = inlined_call_operand.hbm [shape: f32[12,120], index: 0, kind: input, shape index: {}]   ;;  %s632_s1 = inlined_call_operand.hbm [shape: f32[16,12], index: 1, kind: input, shape index: {}]   ;;  %s633_s2 = inlined_call_operand.hbm [shape: f32[120,256], index: 2, kind: input, shape index: {}]   ;;  %s634_s3 = inlined_call_operand.hbm [shape: f32[1,1,1], index: 3, kind: output, shape index: {0}]   ;;  %s635_s4 = inlined_call_operand.hbm [shape: f32[1,1,1], index: 4, kind: output, shape index: {1}]  }
   0x1   :  { %11 = vsyncpa [#allocation6], 0 }
   0x2   :  { %12 = vsyncpa [#allocation4], 0 }
   0x3   :  { %13 = vsyncpa [#allocation10], 0  ;;  %s522_s15 = smov [#allocation5]   ;;  %s523_s17 = smov [#allocation2]  }
   0x4   :  { %s31_s16 = sshll.u32 %s522_s15, 4  ;;  %s19_s18 = sshll.u32 %s523_s17, 4  ;;  %s32_s16 = int_to_ptr.vmem [resolvable:$true] %s31_s16  ;;  %s558_s18 = int_to_ptr.vmem [resolvable:$true] %s19_s18 }
   0x5   :  { %s404_s21 = scalar_lea.hbm %s632_s1, 256 }
   0x6   :  { %p405_p0 = scmp.ne.s32.totalorder %s632_s1, %s404_s21  ;;  %p408_p1 = scmp.lt.u32.totalorder %s404_s21, %s632_s1 }
   0x8   :  { %p410_p2 = pnand %p408_p1, %p405_p0 }
   0xa   :  { %413 = shalt.err (!%p410_p2)
}
   0xb   :  { %s414_s26 = scalar_lea.vmem %s32_s16, 256  ;;  %p419_p4 = scmp.lt.s32.totalorder %s32_s16, %s32_s16 }
   0xc   :  { %p415_p3 = scmp.ne.s32.totalorder %s32_s16, %s414_s26  ;;  %p420_p5 = scmp.lt.s32.totalorder %s414_s26, %s414_s26 }
   0xe   :  { %p421_p6 = por %p420_p5, %p419_p4 }
  0x10   :  { %p422_p7 = pnand %p421_p6, %p415_p3 }
  0x12   :  { %425 = shalt.err (!%p422_p7)
}
  0x13   :  { %s524_s27 = smov 128   ;;  %s525_s28 = smov 8  }
  0x14   :  { %37 = dma.hbm_to_vmem [thread:$0]  %s632_s1, 256, %s32_s16, [#allocation6], %s524_s27, %s524_s27, %s525_s28  }
  0x15   :  { %s426_s7 = scalar_lea.hbm %s631_s0, 256 }
  0x16   :  { %p427_p8 = scmp.ne.s32.totalorder %s631_s0, %s426_s7  ;;  %p430_p9 = scmp.lt.u32.totalorder %s426_s7, %s631_s0 }
  0x18   :  { %p432_p10 = pnand %p430_p9, %p427_p8 }
  0x1a   :  { %435 = shalt.err (!%p432_p10)
}
  0x1b   :  { %s436_s12 = scalar_lea.vmem %s558_s18, 256  ;;  %p441_p12 = scmp.lt.s32.totalorder %s558_s18, %s558_s18 }
  0x1c   :  { %p437_p11 = scmp.ne.s32.totalorder %s558_s18, %s436_s12  ;;  %p442_p13 = scmp.lt.s32.totalorder %s436_s12, %s436_s12 }
  0x1e   :  { %p443_p0 = por %p442_p13, %p441_p12 }
  0x20   :  { %p444_p1 = pnand %p443_p0, %p437_p11 }
  0x22   :  { %447 = shalt.err (!%p444_p1)
}
  0x23   :  { %25 = dma.hbm_to_vmem [thread:$0]  %s631_s0, 256, %s558_s18, [#allocation3], %s524_s27, %s524_s27, %s525_s28  }
  0x24   :  { %s526_s14 = smov [#allocation7]   ;;  %s448_s19 = scalar_lea.hbm %s633_s2, 3840 }
  0x25   :  { %s43_s15 = sshll.u32 %s526_s14, 4  ;;  %p449_p2 = scmp.ne.s32.totalorder %s633_s2, %s448_s19  ;;  %s44_s15 = int_to_ptr.vmem [resolvable:$true] %s43_s15 }
  0x26   :  { %p452_p3 = scmp.lt.u32.totalorder %s448_s19, %s633_s2 }
  0x28   :  { %p454_p4 = pnand %p452_p3, %p449_p2 }
  0x2a   :  { %457 = shalt.err (!%p454_p4)
}
  0x2b   :  { %s458_s24 = scalar_lea.vmem %s44_s15, 3840  ;;  %p463_p6 = scmp.lt.s32.totalorder %s44_s15, %s44_s15 }
  0x2c   :  { %p459_p5 = scmp.ne.s32.totalorder %s44_s15, %s458_s24  ;;  %p464_p7 = scmp.lt.s32.totalorder %s458_s24, %s458_s24 }
  0x2e   :  { %p465_p8 = por %p464_p7, %p463_p6 }
  0x30   :  { %p466_p9 = pnand %p465_p8, %p459_p5 }
  0x32   :  { %469 = shalt.err (!%p466_p9)
}
  0x33   :  { %s527_s0 = smov 256   ;;  %s528_s18 = smov 16  }
  0x34   :  { %49 = dma.hbm_to_vmem [thread:$0]  %s633_s2, 3840, %s44_s15, [#allocation6], %s527_s0, %s527_s0, %s528_s18  }
  0x35   :  { %514 = dma.done.wait [#allocation3], 256  }
  0x36   :  { %515 = vsyncadd [#allocation3], 4294967040 }
  0x37   :  { %516 = dma.done.wait [#allocation6], 4096  }
  0x38   :  { %517 = vsyncadd [#allocation6], 4294963200  ;;  %v529_v0 = vmov 0.0   ;;  %v62_v1 = vld [vmem:[#allocation7 + $0x8] sm:$0xff]  ;;  %v64_v2 = vld [vmem:[#allocation7 + $0x18] sm:$0xff]  ;;  %vm91_vm0 = vcmask 982016  }
  0x39   :  { %162 = vmatprep.mubr.f32.mxu0 %v529_v0  ;;  %255 = vmatprep.mubr.f32.mxu1 %v529_v0  ;;  %v61_v3 = vld [vmem:[#allocation7] sm:$0xff]  ;;  %v355_v4 = vpack.c.bf16 %v64_v2, %v62_v1  ;;  %v63_v5 = vld [vmem:[#allocation7 + $0x10] sm:$0xff]  ;;  %v66_v6 = vld [vmem:[#allocation7 + $0x28] sm:$0xff]  ;;  %vm184_vm1 = vcmask 1043456   ;;  %vm530_vm2 = vmmov 1   ;;  %vm177_vm4 = vcmask 97280  }
  0x3a   :  { %v68_v7 = vld [vmem:[#allocation7 + $0x38] sm:$0xff]  ;;  %v357_v8 = vpack.c.bf16 %v63_v5, %v61_v3  ;;  %v65_v10 = vld [vmem:[#allocation7 + $0x20] sm:$0xff]  ;;  %v67_v11 = vld [vmem:[#allocation7 + $0x30] sm:$0xff]  ;;  %vm314_vm5 = vcmask 0   ;;  %s531_s28 = smov [#allocation8]  }
  0x3b   :  { %v359_v9 = vpack.c.bf16 %v68_v7, %v66_v6  ;;  %v70_v12 = vld [vmem:[#allocation7 + $0x48] sm:$0xff]  ;;  %356 = vmatprep.subr.bf16.mxu0 %v355_v4  ;;  %v72_v13 = vld [vmem:[#allocation7 + $0x58] sm:$0xff]  ;;  %v361_v14 = vpack.c.bf16 %v67_v11, %v65_v10  ;;  %v69_v16 = vld [vmem:[#allocation7 + $0x40] sm:$0xff]  ;;  %s325_s29 = sshll.u32 %s531_s28, 4  ;;  %s326_s29 = int_to_ptr.vmem [resolvable:$true] %s325_s29 }
  0x3c   :  { %358 = vmatpush1.bf16.msra.mxu0 %v357_v8  ;;  %v363_v15 = vpack.c.bf16 %v72_v13, %v70_v12  ;;  %v71_v17 = vld [vmem:[#allocation7 + $0x50] sm:$0xff]  ;;  %v74_v18 = vld [vmem:[#allocation7 + $0x68] sm:$0xff]  ;;  %v76_v19 = vld [vmem:[#allocation7 + $0x78] sm:$0xff]  ;;  %s470_s30 = scalar_lea.vmem %s326_s29, 16  ;;  %s474_s5 = scalar_lea.vmem %s326_s29, 32 }
  0x3d   :  { %360 = vmatprep.subr.bf16.mxu0 %v359_v9  ;;  %v365_v20 = vpack.c.bf16 %v71_v17, %v69_v16  ;;  %v367_v21 = vpack.c.bf16 %v76_v19, %v74_v18  ;;  %v73_v22 = vld [vmem:[#allocation7 + $0x60] sm:$0xff]  ;;  %v75_v23 = vld [vmem:[#allocation7 + $0x70] sm:$0xff]  ;;  %v78_v24 = vld [vmem:[#allocation7 + $0x88] sm:$0xff]  ;;  %p471_p10 = scmp.ne.s32.totalorder %s326_s29, %s470_s30  ;;  %p475_p11 = scmp.lt.s32.totalorder %s326_s29, %s326_s29 }
  0x3e   :  { %v80_v25 = vld [vmem:[#allocation7 + $0x98] sm:$0xff]  ;;  %v369_v26 = vpack.c.bf16 %v75_v23, %v73_v22  ;;  %v77_v28 = vld [vmem:[#allocation7 + $0x80] sm:$0xff]  ;;  %v79_v29 = vld [vmem:[#allocation7 + $0x90] sm:$0xff]  ;;  %p476_p12 = scmp.lt.s32.totalorder %s474_s5, %s470_s30 }
  0x3f   :  { %v371_v27 = vpack.c.bf16 %v80_v25, %v78_v24  ;;  %v82_v30 = vld [vmem:[#allocation7 + $0xa8] sm:$0xff]  ;;  %v84_v31 = vld [vmem:[#allocation7 + $0xb8] sm:$0xff]  ;;  %v373_v32 = vpack.c.bf16 %v79_v29, %v77_v28  ;;  %v81_v34 = vld [vmem:[#allocation7 + $0xa0] sm:$0xff] }
  0x40   :  { %362 = vmatpush1.bf16.msra.mxu0 %v361_v14  ;;  %v375_v33 = vpack.c.bf16 %v84_v31, %v82_v30  ;;  %v83_v35 = vld [vmem:[#allocation7 + $0xb0] sm:$0xff]  ;;  %v86_v36 = vld [vmem:[#allocation7 + $0xc8] sm:$0xff]  ;;  %v88_v37 = vld [vmem:[#allocation7 + $0xd8] sm:$0xff]  ;;  %p477_p13 = por %p476_p12, %p475_p11 }
  0x41   :  { %364 = vmatprep.subr.bf16.mxu0 %v363_v15  ;;  %v377_v38 = vpack.c.bf16 %v83_v35, %v81_v34  ;;  %v379_v39 = vpack.c.bf16 %v88_v37, %v86_v36  ;;  %v85_v40 = vld [vmem:[#allocation7 + $0xc0] sm:$0xff]  ;;  %v87_v41 = vld [vmem:[#allocation7 + $0xd0] sm:$0xff]  ;;  %v90_v43 = vld [vmem:[#allocation7 + $0xe8] sm:$0xff] }
  0x42   :  { %v381_v42 = vpack.c.bf16 %v87_v41, %v85_v40  ;;  %v89_v44 = vld [vmem:[#allocation7 + $0xe0] sm:$0xff]  ;;  %v60_v46 = vld [vmem:[#allocation2 + $0x8] sm:$0xf]  ;;  %vm384_vm3 = vmpackc.low %vm184_vm1, %vm530_vm2  ;;  %p478_p0 = pnand %p477_p13, %p471_p10 }
  0x43   :  { %v59_v45 = vld [vmem:[#allocation2] sm:$0xff]  ;;  %v175_v53 = vld [vmem:[#allocation5] sm:$0xff]  ;;  %v176_v54 = vld [vmem:[#allocation5 + $0x8] sm:$0xff] }
  0x44   :  { %366 = vmatpush1.bf16.msra.mxu0 %v365_v20 }
  0x45   :  { %368 = vmatprep.subr.bf16.mxu0 %v367_v21 }
  0x48   :  { %370 = vmatpush1.bf16.msra.mxu0 %v369_v26 }
  0x49   :  { %372 = vmatprep.subr.bf16.mxu0 %v371_v27 }
  0x4c   :  { %374 = vmatpush1.bf16.msra.mxu0 %v373_v32 }
  0x4d   :  { %376 = vmatprep.subr.bf16.mxu0 %v375_v33 }
  0x50   :  { %378 = vmatpush1.bf16.msra.mxu0 %v377_v38 }
  0x51   :  { %380 = vmatprep.subr.bf16.mxu0 %v379_v39 }
  0x54   :  { %382 = vmatpush1.bf16.msra.mxu0 %v381_v42 }
  0x55   :  { %126 = vmatprep.subr.mxu0 %v90_v43 }
  0x58   :  { %127 = vmatpush1.msra.mxu0 %v89_v44 }
  0x59   :  { %349 = vmatmul.mubr.msk.f32.vlgmr.msra.gmra.mrb[0].mxu0 %vm91_vm0, %v59_v45 }
  0x5a   :  { %168 = vmatprep.mubr.f32.mxu0 %v529_v0 }
  0x5d   :  { %350 = vmatmul.mubr.msk.f32.gmra.mrb[2].mxu0 %vm91_vm0, %v60_v46 }
 0x12c   :  { %v164_v47 = vpop.f32.mrb[0].mxu0 }
 0x12d   :  { %v166_v48 = vpop.f32.mrb[1].mxu0 }
 0x130   :  { %v170_v49 = vpop.f32.mrb[2].mxu0 }
 0x131   :  { %v386_v50 = vpack.c.bf16 %v170_v49, %v164_v47  ;;  %v172_v51 = vpop.f32.mrb[3].mxu0 }
 0x132   :  { %v383_v52 = vpack.c.bf16 %v172_v51, %v166_v48 }
 0x134   :  { %385 = vmatprep.subr.msk.bf16.mxu1 %vm384_vm3, %v383_v52 }
 0x135   :  { %388 = vmatpush1.bf16.msk.msra.mxu1 %vm384_vm3, %v386_v50 }
 0x138   :  { %353 = vmatmul.mubr.msk.f32.vlgmr.msra.gmra.mrb[0].mxu1 %vm177_vm4, %v175_v53 }
 0x139   :  { %261 = vmatprep.mubr.f32.mxu1 %v529_v0 }
 0x13c   :  { %354 = vmatmul.mubr.msk.f32.gmra.mrb[2].mxu1 %vm177_vm4, %v176_v54 }
 0x20b   :  { %v257_v55 = vpop.f32.mrb[0].mxu1 }
 0x20c   :  { %v268_v56 = vmax.f32 %v257_v55, -1.0  ;;  %v259_v57 = vpop.f32.mrb[1].mxu1 }
 0x20d   :  { %v269_v58 = vmax.f32 %v259_v57, -1.0 }
 0x20e   :  { %v272_v59 = vmin.f32 %v268_v56, 1.5 }
 0x20f   :  { %v273_v60 = vmin.f32 %v269_v58, 1.5  ;;  %v263_v61 = vpop.f32.mrb[2].mxu1 }
 0x210   :  { %v270_v62 = vmax.f32 %v263_v61, -1.0  ;;  %v265_v63 = vpop.f32.mrb[3].mxu1 }
 0x211   :  { %v276_v1 = vadd.f32 %v273_v60, %v272_v59  ;;  %v271_v2 = vmax.f32 %v265_v63, -1.0 }
 0x212   :  { %v274_v3 = vmin.f32 %v270_v62, 1.5 }
 0x213   :  { %v275_v4 = vmin.f32 %v271_v2, 1.5 }
 0x214   :  { %v277_v5 = vadd.f32 %v276_v1, %v274_v3 }
 0x216   :  { %v278_v6 = vadd.f32 %v277_v5, %v275_v4 }
 0x218   :  { %279 = vadd.xlane.f32.xlu0 %v278_v6 }
 0x2a5   :  { %v280_v7 = vpop.xlane.xlu0 %279 }
 0x2a6   :  { %v281_v0 = vrot.slane %v280_v7, 4 }
 0x2a8   :  { %v282_v8 = vadd.f32 %v281_v0, %v280_v7 }
 0x2aa   :  { %v283_v9 = vrot.slane %v282_v8, 2 }
 0x2ac   :  { %v284_v10 = vadd.f32 %v283_v9, %v282_v8 }
 0x2ae   :  { %v285_v11 = vrot.slane %v284_v10, 1 }
 0x2b0   :  { %v286_v12 = vadd.f32 %v285_v11, %v284_v10 }
 0x2b2   :  { %389 = vpush %v286_v12 }
 0x2e3   :  { %s390_s2 = spop %389 }
 0x2e4   :  { %s290_s27 = smul.f32 0.00024414063, %s390_s2  ;;  %v312_v13 = vstv %s390_s2 }
 0x2e5   :  { %315 = vst.msk [vmem:[#allocation8] sm:$0x1] %vm314_vm5, %v312_v13 }
 0x2e6   :  { %v291_v14 = vstv %s290_s27 }
 0x2e7   :  { %v292_v15 = vsub.f32 %v272_v59, %v291_v14  ;;  %v293_v16 = vsub.f32 %v273_v60, %v291_v14  ;;  %v294_v17 = vsub.f32 %v274_v3, %v291_v14  ;;  %v295_v20 = vsub.f32 %v275_v4, %v291_v14 }
 0x2e9   :  { %v296_v18 = vmul.f32 %v292_v15, %v292_v15  ;;  %v297_v19 = vmul.f32 %v293_v16, %v293_v16  ;;  %v298_v21 = vmul.f32 %v294_v17, %v294_v17  ;;  %v299_v23 = vmul.f32 %v295_v20, %v295_v20 }
 0x2eb   :  { %v300_v22 = vadd.f32 %v297_v19, %v296_v18 }
 0x2ed   :  { %v301_v24 = vadd.f32 %v300_v22, %v298_v21 }
 0x2ef   :  { %v302_v25 = vadd.f32 %v301_v24, %v299_v23 }
 0x2f1   :  { %303 = vadd.xlane.f32.xlu0 %v302_v25 }
 0x2f2   :  { %481 = shalt.err (!%p478_p0)
}
 0x2f3   :  { %s482_s8 = scalar_lea.hbm %s634_s3, 16 }
 0x2f4   :  { %p483_p1 = scmp.ne.s32.totalorder %s634_s3, %s482_s8  ;;  %p486_p2 = scmp.lt.u32.totalorder %s482_s8, %s634_s3 }
 0x2f6   :  { %p488_p3 = pnand %p486_p2, %p483_p1 }
 0x2f8   :  { %491 = shalt.err (!%p488_p3)
}
 0x2f9   :  { %328 = dma.vmem_to_hbm [thread:$0]  %s326_s29, 16, %s634_s3, [#allocation4]  }
 0x2fa   :  { %s532_s14 = smov [#allocation9]  }
 0x2fb   :  { %s335_s15 = sshll.u32 %s532_s14, 4  ;;  %s336_s15 = int_to_ptr.vmem [resolvable:$true] %s335_s15 }
 0x2fc   :  { %s492_s17 = scalar_lea.vmem %s336_s15, 16  ;;  %s496_s19 = scalar_lea.vmem %s336_s15, 32 }
 0x2fd   :  { %p493_p4 = scmp.ne.s32.totalorder %s336_s15, %s492_s17  ;;  %p497_p5 = scmp.lt.s32.totalorder %s336_s15, %s336_s15 }
 0x2fe   :  { %p498_p6 = scmp.lt.s32.totalorder %s496_s19, %s492_s17 }
 0x300   :  { %p499_p7 = por %p498_p6, %p497_p5 }
 0x302   :  { %p500_p8 = pnand %p499_p7, %p493_p4 }
 0x37e   :  { %v304_v26 = vpop.xlane.xlu0 %303 }
 0x37f   :  { %v305_v27 = vrot.slane %v304_v26, 4 }
 0x381   :  { %v306_v28 = vadd.f32 %v305_v27, %v304_v26 }
 0x383   :  { %v307_v29 = vrot.slane %v306_v28, 2 }
 0x385   :  { %v308_v30 = vadd.f32 %v307_v29, %v306_v28 }
 0x387   :  { %v309_v31 = vrot.slane %v308_v30, 1 }
 0x389   :  { %v310_v32 = vadd.f32 %v309_v31, %v308_v30 }
 0x38b   :  { %391 = vpush %v310_v32 }
 0x3bc   :  { %s392_s16 = spop %391 }
 0x3bd   :  { %v316_v33 = vstv %s392_s16 }
 0x3be   :  { %318 = vst.msk [vmem:[#allocation9] sm:$0x1] %vm314_vm5, %v316_v33 }
 0x3bf   :  { %503 = shalt.err (!%p500_p8)
}
 0x3c0   :  { %s504_s21 = scalar_lea.hbm %s635_s4, 16 }
 0x3c1   :  { %p505_p9 = scmp.ne.s32.totalorder %s635_s4, %s504_s21  ;;  %p508_p10 = scmp.lt.u32.totalorder %s504_s21, %s635_s4 }
 0x3c3   :  { %p510_p11 = pnand %p508_p10, %p505_p9 }
 0x3c5   :  { %513 = shalt.err (!%p510_p11)
}
 0x3c6   :  { %338 = dma.vmem_to_hbm [thread:$0]  %s336_s15, 16, %s635_s4, [#allocation10]  }
 0x3c7   :  { %518 = dma.done.wait [#allocation4], 16  }
 0x3c8   :  { %519 = vsyncadd [#allocation4], 4294967280 }
 0x3c9   :  { %520 = dma.done.wait [#allocation10], 16  }
 0x3ca   :  { %521 = vsyncadd [#allocation10], 4294967280 }
 0x3cb   :  { %345 = vsyncpa [#allocation3], 1 }
 0x3cc   :  { %346 = vsyncpa [#allocation6], 1 }
 0x3cd   :  { %347 = vsyncpa [#allocation4], 1 }
 0x3ce   :  { %348 = vsyncpa [#allocation10], 1 }

</bundles_post_ra>
